<compile_context>
chip_gen: v7x
topology: tpu7x:2x2x1
jax: 0.10.0
libtpu: 0.0.40
codegen_flags: <defaults>
</compile_context>

<pallas_src>
import functools

import jax
import jax.numpy as jnp
from jax.experimental import pallas as pl
from jax.experimental.pallas import tpu as pltpu

LANE = 128            # lane-dense last dim -> unmasked vst
MAX_BLOCK_ROWS = 2048 # 2048 x 128 x 4B = 1 MiB per block buffer (fits v7x VMEM easily)


def _sparse_dropout_kernel(seed_ref, v_ref, o_ref, *, p):
    """Dropout over one (block_rows, 128) tile of sparse values.

    seed_ref : SMEM (1,) int32        -- RNG seed
    v_ref    : VMEM (block_rows, 128) -- input values (zero-padded tail)
    o_ref    : VMEM (block_rows, 128) -- dropped + rescaled values
    """
    block_rows, lane = v_ref.shape
    blk = pl.program_id(0)

    # Global linear index of every element in the padded values buffer, so
    # each grid block (and each TensorCore on v7x) gets an independent mask.
    row = jax.lax.broadcasted_iota(jnp.int32, (block_rows, lane), 0)
    col = jax.lax.broadcasted_iota(jnp.int32, (block_rows, lane), 1)
    gidx = (blk * block_rows + row) * lane + col

    # Counter-based hash: murmur3 finalizer of (index, seed).  Pure VPU
    # integer ops (xor / shift / mul), no float conversion.
    seed_u = seed_ref[0].astype(jnp.uint32)
    x = gidx.astype(jnp.uint32) ^ (seed_u * jnp.uint32(0x9E3779B9))
    x ^= x >> 16
    x = x * jnp.uint32(0x85EBCA6B)
    x ^= x >> 13
    x = x * jnp.uint32(0xC2B2AE35)
    x ^= x >> 16

    # Keep with prob (1 - p): single unsigned threshold compare, exact to 2^-32.
    threshold = jnp.uint32(int(p * (2.0 ** 32)))
    keep = x >= threshold

    v = v_ref[...].astype(jnp.float32)           # load tile once
    scale = jnp.float32(1.0 / (1.0 - p))
    o_ref[...] = jnp.where(keep, v * scale, jnp.float32(0.0)).astype(o_ref.dtype)


def sparse_dropout(indices, values, dense_shape, p, seed, training=True):
    """JAX/Pallas equivalent of SparseDropout.forward.

    indices:     (ndim, nnz) int32  -- coalesced COO indices
    values:      (nnz,)             -- nonzero values
    dense_shape: tuple              -- dense shape of the sparse tensor
    Returns (indices, new_values, dense_shape).
    """
    p = float(p)
    if not training or p == 0.0:
        # F.dropout is identity when not training (or p == 0).
        return indices, values, dense_shape
    if p >= 1.0:
        return indices, jnp.zeros_like(values), dense_shape

    nnz = values.shape[0]

    # Tile the 1-D values vector as a lane-dense (rows, 128) slab and pick a
    # balanced row-block size (multiple of 8 sublanes, <= ~1 MiB f32) so the
    # grid double-buffers cleanly and the padding tail stays small.
    rows = (nnz + LANE - 1) // LANE
    num_blocks = (rows + MAX_BLOCK_ROWS - 1) // MAX_BLOCK_ROWS
    block_rows = (((rows + num_blocks - 1) // num_blocks) + 7) // 8 * 8
    rows_padded = num_blocks * block_rows
    pad = rows_padded * LANE - nnz

    v2d = jnp.pad(values, (0, pad)).reshape(rows_padded, LANE)
    seed_arr = jnp.asarray([seed], dtype=jnp.int32)

    extra = {}
    if jax.default_backend() == "tpu":
        # Shard the row grid across TensorCores (2 TCs on v7x); no-op on v5e/v6e.
        extra["compiler_params"] = pltpu.CompilerParams(
            dimension_semantics=("parallel",))

    out2d = pl.pallas_call(
        functools.partial(_sparse_dropout_kernel, p=p),
        grid=(num_blocks,),
        in_specs=[
            pl.BlockSpec(memory_space=pltpu.MemorySpace.SMEM),        # seed scalar
            pl.BlockSpec((block_rows, LANE), lambda i: (i, 0)),       # values tile
        ],
        out_specs=pl.BlockSpec((block_rows, LANE), lambda i: (i, 0)),
        out_shape=jax.ShapeDtypeStruct((rows_padded, LANE), values.dtype),
        **extra,
    )(seed_arr, v2d)

    # TODO(synk): the flatten+slice below is one extra HBM pass; a masked tail
    # store inside the kernel could drop it, at the cost of dynamic-shape plumbing.
    new_values = out2d.reshape(-1)[:nnz]
    return indices, new_values, dense_shape


def _make_sparse_input(key, dense_shape, density=0.4):
    """Build a deterministic coalesced COO sparse tensor from a dense one."""
    k1, k2 = jax.random.split(key)
    dense = jax.random.normal(k1, dense_shape, dtype=jnp.float32)
    mask = jax.random.uniform(k2, dense_shape) < density
    dense = jnp.where(mask, dense, 0.0)
    # nonzero on a concrete array (outside jit) -> coalesced row-major indices
    idx = jnp.stack(jnp.nonzero(dense), axis=0).astype(jnp.int32)   # (4, nnz)
    vals = dense[tuple(idx)]                                        # (nnz,)
    return idx, vals, dense_shape


if __name__ == "__main__":
    key = jax.random.PRNGKey(0)
    dense_shape = (2, 4, 16, 16)          # small NCHW-shaped sparse tensor
    indices, values, shape = _make_sparse_input(key, dense_shape, density=0.4)

    p = 0.3
    out_idx, out_vals, out_shape = sparse_dropout(
        indices, values, shape, p=p, seed=0, training=True
    )
    out_vals = jax.block_until_ready(out_vals)

    # Sanity: indices/shape/length unchanged.
    assert out_idx.shape == indices.shape
    assert out_shape == shape
    assert out_vals.shape == values.shape

    # Surviving values are scaled by 1/(1-p); some kept, some dropped.
    scale = 1.0 / (1.0 - p)
    kept = out_vals != 0.0    # original nnz values are nonzero by construction
    assert bool(jnp.any(kept)) and bool(jnp.any(~kept))
    assert bool(jnp.allclose(out_vals[kept], values[kept] * scale,
                             rtol=1e-5, atol=1e-6))
    # Drop fraction roughly p (very loose statistical band).
    drop_frac = float(jnp.mean((~kept).astype(jnp.float32)))
    assert 0.15 < drop_frac < 0.45

    # Eval mode is identity (matches F.dropout with training=False).
    _, id_vals, _ = sparse_dropout(indices, values, shape, p=p, seed=0,
                                   training=False)
    assert bool(jnp.array_equal(id_vals, values))

    print("KERNEL_OK")
</pallas_src>

<mosaic_0001>
module attributes {stable_mosaic.version = 11 : i64} {
  func.func @_sparse_dropout_kernel(%arg0: i32, %arg1: memref<1xi32, #tpu.memory_space<smem>>, %arg2: memref<8x128xf32, #tpu.memory_space<vmem>>, %arg3: memref<8x128xf32, #tpu.memory_space<vmem>>) attributes {dimension_semantics = [#tpu.dimension_semantics<arbitrary>], iteration_bounds = array<i64: 1>, scalar_prefetch = 0 : i64, scratch_operands = 0 : i64, tpu.core_type = #tpu.core_type<tc>, window_params = [{transform_indices = @transform_0, window_bounds = array<i64: 1>}, {transform_indices = @transform_1, window_bounds = array<i64: 8, 128>}, {transform_indices = @transform_2, window_bounds = array<i64: 8, 128>}]} {
    %0 = tpu.iota {dimensions = array<i32: 0>} : vector<8x128xi32>
    %1 = tpu.iota {dimensions = array<i32: 1>} : vector<8x128xi32>
    %c8_i32 = arith.constant 8 : i32
    %2 = arith.muli %arg0, %c8_i32 : i32
    %3 = vector.broadcast %2 : i32 to vector<8x128xi32>
    %4 = arith.addi %3, %0 : vector<8x128xi32>
    %c128_i32 = arith.constant 128 : i32
    %5 = vector.broadcast %c128_i32 : i32 to vector<8x128xi32>
    %6 = arith.muli %4, %5 : vector<8x128xi32>
    %7 = arith.addi %6, %1 : vector<8x128xi32>
    %c0 = arith.constant 0 : index
    %8 = memref.load %arg1[%c0] : memref<1xi32, #tpu.memory_space<smem>>
    %c-1640531527_i32 = arith.constant -1640531527 : i32
    %9 = arith.muli %8, %c-1640531527_i32 : i32
    %10 = vector.broadcast %9 : i32 to vector<8x128xi32>
    %11 = arith.xori %7, %10 : vector<8x128xi32>
    %c16_i32 = arith.constant 16 : i32
    %12 = vector.broadcast %c16_i32 : i32 to vector<8x128xi32>
    %13 = arith.shrui %11, %12 : vector<8x128xi32>
    %14 = arith.xori %11, %13 : vector<8x128xi32>
    %c-2048144789_i32 = arith.constant -2048144789 : i32
    %15 = vector.broadcast %c-2048144789_i32 : i32 to vector<8x128xi32>
    %16 = arith.muli %14, %15 : vector<8x128xi32>
    %c13_i32 = arith.constant 13 : i32
    %17 = vector.broadcast %c13_i32 : i32 to vector<8x128xi32>
    %18 = arith.shrui %16, %17 : vector<8x128xi32>
    %19 = arith.xori %16, %18 : vector<8x128xi32>
    %c-1028477387_i32 = arith.constant -1028477387 : i32
    %20 = vector.broadcast %c-1028477387_i32 : i32 to vector<8x128xi32>
    %21 = arith.muli %19, %20 : vector<8x128xi32>
    %c16_i32_0 = arith.constant 16 : i32
    %22 = vector.broadcast %c16_i32_0 : i32 to vector<8x128xi32>
    %23 = arith.shrui %21, %22 : vector<8x128xi32>
    %24 = arith.xori %21, %23 : vector<8x128xi32>
    %c1288490188_i32 = arith.constant 1288490188 : i32
    %25 = vector.broadcast %c1288490188_i32 : i32 to vector<8x128xi32>
    %26 = arith.cmpi uge, %24, %25 : vector<8x128xi32>
    %c0_1 = arith.constant 0 : index
    %c0_2 = arith.constant 0 : index
    %27 = vector.load %arg2[%c0_1, %c0_2] : memref<8x128xf32, #tpu.memory_space<vmem>>, vector<8x128xf32>
    %cst = arith.constant 1.42857146 : f32
    %28 = vector.broadcast %cst : f32 to vector<8x128xf32>
    %29 = arith.mulf %27, %28 : vector<8x128xf32>
    %cst_3 = arith.constant 0.000000e+00 : f32
    %30 = vector.broadcast %cst_3 : f32 to vector<8x128xf32>
    %31 = arith.select %26, %29, %30 : vector<8x128xi1>, vector<8x128xf32>
    %c0_4 = arith.constant 0 : index
    %c0_5 = arith.constant 0 : index
    %32 = vector.load %arg3[%c0_4, %c0_5] : memref<8x128xf32, #tpu.memory_space<vmem>>, vector<8x128xf32>
    tpu.vector_store %arg3[%c0_4, %c0_5], %31 {strides = array<i32>} : memref<8x128xf32, #tpu.memory_space<vmem>>, vector<8x128xf32>,
    return
  }
  func.func @transform_0(%arg0: i32) -> i32 {
    %c0_i32 = arith.constant 0 : i32
    %c0_i32_0 = arith.constant 0 : i32
    return %c0_i32 : i32
  }
  func.func @transform_1(%arg0: i32) -> (i32, i32) {
    %c0_i32 = arith.constant 0 : i32
    %c0_i32_0 = arith.constant 0 : i32
    return %arg0, %c0_i32 : i32, i32
  }
  func.func @transform_2(%arg0: i32) -> (i32, i32) {
    %c0_i32 = arith.constant 0 : i32
    %c0_i32_0 = arith.constant 0 : i32
    return %arg0, %c0_i32 : i32, i32
  }
}

</mosaic_0001>

<bundles_post_ra>
// kernel: tpu_custom_call.1
= control target key start
LH: loop header
LB: loop body
LE: loop exit
PB: predicated region body
PF: predicated region fallthrough
CT: control target
= control target key end

     0   :  { %8 = vsyncpa [#allocation4], 0  ;;  %s160_s0 = inlined_call_operand.<no memory space> [shape: s32[1], index: 0, kind: input, shape index: {}]   ;;  %s161_s1 = inlined_call_operand.hbm [shape: f32[8,128], index: 1, kind: input, shape index: {}]   ;;  %s162_s2 = inlined_call_operand.hbm [shape: f32[8,128], index: 2, kind: output, shape index: {}]  }
   0x1   :  { %9 = vsyncpa [#allocation5], 0  ;;  %s116_s9 = smov [#allocation3]   ;;  %s68_s13 = scalar_lea.hbm %s161_s1, 128 }
   0x2   :  { %s18_s10 = sshll.u32 %s116_s9, 4  ;;  %p69_p0 = scmp.ne.s32.totalorder %s161_s1, %s68_s13  ;;  %s19_s10 = int_to_ptr.vmem [resolvable:$true] %s18_s10 }
   0x3   :  { %p72_p1 = scmp.lt.u32.totalorder %s68_s13, %s161_s1 }
   0x5   :  { %p74_p2 = pnand %p72_p1, %p69_p0 }
   0x7   :  { %77 = shalt.err (!%p74_p2)
}
   0x8   :  { %s78_s18 = scalar_lea.vmem %s19_s10, 128  ;;  %p83_p4 = scmp.lt.s32.totalorder %s19_s10, %s19_s10 }
   0x9   :  { %p79_p3 = scmp.ne.s32.totalorder %s19_s10, %s78_s18  ;;  %p84_p5 = scmp.lt.s32.totalorder %s78_s18, %s78_s18 }
   0xb   :  { %p85_p6 = por %p84_p5, %p83_p4 }
   0xd   :  { %p86_p7 = pnand %p85_p6, %p79_p3 }
   0xf   :  { %89 = shalt.err (!%p86_p7)
}
  0x10   :  { %21 = dma.hbm_to_vmem [thread:$0]  %s161_s1, 128, %s19_s10, [#allocation4]  }
  0x11   :  { %112 = dma.done.wait [#allocation4], 128  }
  0x12   :  { %113 = vsyncadd [#allocation4], 4294967168  ;;  %v25_v0 = vlaneseq  ;;  %s35_s23 = smul.u32 2654435769, %s160_s0  ;;  %v47_v13 = vld [vmem:[#allocation3] sm:$0xff]  ;;  %s117_s1 = smov [#allocation6]  }
  0x13   :  { %v48_v15 = vmul.f32 1.4285715, %v47_v13  ;;  %s57_s24 = sshll.u32 %s117_s1, 4  ;;  %s58_s24 = int_to_ptr.vmem [resolvable:$true] %s57_s24 }
  0x14   :  { %v26_v1 = vshrl.u32 %v25_v0, 7  ;;  %v28_v2 = vand.u32 127, %v25_v0  ;;  %v36_v4 = vstv %s35_s23  ;;  %s90_s0 = scalar_lea.vmem %s58_s24, 128  ;;  %p95_p9 = scmp.lt.s32.totalorder %s58_s24, %s58_s24 }
  0x15   :  { %p91_p8 = scmp.ne.s32.totalorder %s58_s24, %s90_s0  ;;  %p96_p10 = scmp.lt.s32.totalorder %s90_s0, %s90_s0 }
  0x16   :  { %v32_v3 = vmul.u32 128, %v26_v1 }
  0x17   :  { %p97_p11 = por %p96_p10, %p95_p9 }
  0x18   :  { %v33_v5 = vadd.s32 %v32_v3, %v28_v2 }
  0x19   :  { %p98_p12 = pnand %p97_p11, %p91_p8 }
  0x1a   :  { %v37_v6 = vxor.u32 %v36_v4, %v33_v5 }
  0x1c   :  { %v38_v7 = vshrl.u32 %v37_v6, 16 }
  0x1e   :  { %v39_v8 = vxor.u32 %v38_v7, %v37_v6 }
  0x20   :  { %v40_v9 = vmul.u32 2246822507, %v39_v8 }
  0x22   :  { %v41_v10 = vshrl.u32 %v40_v9, 13 }
  0x24   :  { %v42_v11 = vxor.u32 %v41_v10, %v40_v9 }
  0x26   :  { %v43_v12 = vmul.u32 3266489909, %v42_v11 }
  0x28   :  { %v44_v14 = vshrl.u32 %v43_v12, 16 }
  0x2a   :  { %v45_v16 = vxor.u32 %v44_v14, %v43_v12 }
  0x2c   :  { %vm46_vm0 = vcmp.ge.u32.totalorder %v45_v16, 1288490188 }
  0x2d   :  { %v49_v17 = vsel %vm46_vm0, %v48_v15, 0.0 }
  0x2e   :  { %50 = vst [vmem:[#allocation6] sm:$0xff] %v49_v17 }
  0x2f   :  { %101 = shalt.err (!%p98_p12)
}
  0x30   :  { %s102_s27 = scalar_lea.hbm %s162_s2, 128 }
  0x31   :  { %p103_p13 = scmp.ne.s32.totalorder %s162_s2, %s102_s27  ;;  %p106_p0 = scmp.lt.u32.totalorder %s102_s27, %s162_s2 }
  0x33   :  { %p108_p1 = pnand %p106_p0, %p103_p13 }
  0x35   :  { %111 = shalt.err (!%p108_p1)
}
  0x36   :  { %60 = dma.vmem_to_hbm [thread:$0]  %s58_s24, 128, %s162_s2, [#allocation5]  }
  0x37   :  { %114 = dma.done.wait [#allocation5], 128  }
  0x38   :  { %115 = vsyncadd [#allocation5], 4294967168 }
  0x39   :  { %64 = vsyncpa [#allocation4], 1 }
  0x3a   :  { %65 = vsyncpa [#allocation5], 1 }

</bundles_post_ra>
